<compile_context>
chip_gen: v7x
topology: tpu7x:2x2x1
jax: 0.10.0
libtpu: 0.0.40
codegen_flags: <defaults>
</compile_context>

<pallas_src>
import math

import jax
import jax.numpy as jnp
from jax.experimental import pallas as pl
from jax.experimental.pallas import tpu as pltpu

HIDDEN = 256
LANE = 128


def _round_up(x, m):
    return ((x + m - 1) // m) * m


def _classifier_kernel(x_ref, w1_ref, b1_ref, w2_ref, b2_ref, o_ref):
    # x_ref:  (TB, C_in)        VMEM (input dtype)
    # w1_ref: (C_in, H)         VMEM (compute dtype, e.g. bf16) -- resident
    # b1_ref: (1, H)            VMEM f32                        -- resident
    # w2_ref: (H, C_out_pad)    VMEM (compute dtype)            -- resident
    # b2_ref: (1, C_out_pad)    VMEM f32                        -- resident
    # o_ref:  (TB, C_out_pad)   VMEM (output dtype)
    x = x_ref[...].astype(w1_ref.dtype)
    # First linear: MXU matmul in compute dtype, f32 accumulation.
    h = jnp.dot(x, w1_ref[...], preferred_element_type=jnp.float32) + b1_ref[...]
    # Bias-add + ReLU stay in f32 (no bf16 VPU on v5e); cast only for the MXU.
    h = jnp.maximum(h, 0.0).astype(w2_ref.dtype)
    out = jnp.dot(h, w2_ref[...], preferred_element_type=jnp.float32) + b2_ref[...]
    o_ref[...] = out.astype(o_ref.dtype)


def classifier_forward(latent, w1, b1, w2, b2, *,
                       compute_dtype=jnp.bfloat16, block_batch=256):
    """latent: [B, C_in] -> [B, C_out].

    Weights are [in_features, out_features] (transpose of PyTorch nn.Linear),
    biases are [1, out_features].
    """
    B, C_in = latent.shape
    H = w1.shape[1]
    C_out = w2.shape[1]
    out_dtype = latent.dtype

    # ---- lane-dense output: pad C_out up to a multiple of 128 -------------
    C_out_p = max(_round_up(C_out, LANE), LANE)
    if C_out_p != C_out:
        w2 = jnp.pad(w2, ((0, 0), (0, C_out_p - C_out)))
        b2 = jnp.pad(b2, ((0, 0), (0, C_out_p - C_out)))

    # ---- MXU operand dtype (accumulation stays f32), f32 biases -----------
    w1 = w1.astype(compute_dtype)
    w2 = w2.astype(compute_dtype)
    b1 = b1.astype(jnp.float32).reshape(1, H)
    b2 = b2.astype(jnp.float32).reshape(1, C_out_p)

    # ---- batch tiling: TB multiple of 8, B padded to a multiple of TB -----
    TB = min(_round_up(block_batch, 8), _round_up(B, 8))
    B_p = _round_up(B, TB)
    if B_p != B:
        latent = jnp.pad(latent, ((0, B_p - B), (0, 0)))
    grid = (B_p // TB,)

    # ---- VMEM budget: 2x(double-buffered tiles) + resident weights --------
    in_sz = jnp.dtype(latent.dtype).itemsize
    cd_sz = jnp.dtype(compute_dtype).itemsize
    out_sz = jnp.dtype(out_dtype).itemsize
    tile_bytes = (
        2 * TB * C_in * in_sz                       # x tiles (double buffered)
        + 2 * TB * C_out_p * out_sz                 # out tiles
        + 2 * (C_in * H + H * C_out_p) * cd_sz      # weights (buffered)
        + 2 * (H + C_out_p) * 4                     # biases
        + 4 * TB * H * 4                            # f32 intermediates + headroom
    )
    # Stay under v7x's 64 MiB physical VMEM per core.
    vmem_limit = int(min(max(tile_bytes, 32 * 1024 * 1024), 60 * 1024 * 1024))

    cost = pl.CostEstimate(
        flops=2 * B_p * (C_in * H + H * C_out_p),
        transcendentals=0,
        bytes_accessed=(B_p * (C_in * in_sz + C_out_p * out_sz)
                        + (C_in * H + H * C_out_p) * cd_sz
                        + (H + C_out_p) * 4),
    )

    out_padded = pl.pallas_call(
        _classifier_kernel,
        out_shape=jax.ShapeDtypeStruct((B_p, C_out_p), out_dtype),
        grid=grid,
        in_specs=[
            pl.BlockSpec((TB, C_in), lambda i: (i, 0)),       # x: streamed
            pl.BlockSpec((C_in, H), lambda i: (0, 0)),        # w1: resident
            pl.BlockSpec((1, H), lambda i: (0, 0)),           # b1: resident
            pl.BlockSpec((H, C_out_p), lambda i: (0, 0)),     # w2: resident
            pl.BlockSpec((1, C_out_p), lambda i: (0, 0)),     # b2: resident
        ],
        out_specs=pl.BlockSpec((TB, C_out_p), lambda i: (i, 0)),
        compiler_params=pltpu.CompilerParams(
            dimension_semantics=("parallel",),
            vmem_limit_bytes=vmem_limit,
        ),
        cost_estimate=cost,
    )(latent, w1, b1, w2, b2)

    # Slice off batch padding and lane padding.
    return out_padded[:B, :C_out]


def init_classifier_params(key, in_channels, out_channels, dtype=jnp.float32):
    """Deterministic init mimicking nn.Linear default (uniform(-1/sqrt(fan_in), .))."""
    k1, k2, k3, k4 = jax.random.split(key, 4)
    bound1 = 1.0 / math.sqrt(in_channels)
    bound2 = 1.0 / math.sqrt(HIDDEN)
    w1 = jax.random.uniform(k1, (in_channels, HIDDEN), dtype, -bound1, bound1)
    b1 = jax.random.uniform(k2, (1, HIDDEN), dtype, -bound1, bound1)
    w2 = jax.random.uniform(k3, (HIDDEN, out_channels), dtype, -bound2, bound2)
    b2 = jax.random.uniform(k4, (1, out_channels), dtype, -bound2, bound2)
    return w1, b1, w2, b2


def reference_forward(latent, w1, b1, w2, b2):
    h = jnp.maximum(latent @ w1 + b1, 0.0)
    return h @ w2 + b2


if __name__ == "__main__":
    in_channels = 32
    out_channels = 8

    key = jax.random.PRNGKey(0)
    k_x, k_p, k_x2 = jax.random.split(key, 3)
    w1, b1, w2, b2 = init_classifier_params(k_p, in_channels, out_channels)

    # --- case 1: tiny batch (B=2), single tile, pads batch + lanes ---------
    latent = jax.random.normal(k_x, (2, in_channels), jnp.float32)
    out = jax.block_until_ready(classifier_forward(latent, w1, b1, w2, b2))
    ref = reference_forward(latent, w1, b1, w2, b2)
    assert out.shape == (2, out_channels)
    assert jnp.allclose(out, ref, atol=2e-2, rtol=2e-2), "mismatch vs reference (B=2)"

    # --- case 2: multi-tile batch with padding (exercises the grid) --------
    latent2 = jax.random.normal(k_x2, (37, in_channels), jnp.float32)
    out2 = jax.block_until_ready(
        classifier_forward(latent2, w1, b1, w2, b2, block_batch=16))
    ref2 = reference_forward(latent2, w1, b1, w2, b2)
    assert out2.shape == (37, out_channels)
    assert jnp.allclose(out2, ref2, atol=2e-2, rtol=2e-2), "mismatch vs reference (B=37)"

    print("KERNEL_OK")
</pallas_src>

<mosaic_0001>
module attributes {stable_mosaic.version = 11 : i64} {
  func.func @_classifier_kernel(%arg0: i32, %arg1: memref<8x32xf32, #tpu.memory_space<vmem>>, %arg2: memref<32x256xbf16, #tpu.memory_space<vmem>>, %arg3: memref<1x256xf32, #tpu.memory_space<vmem>>, %arg4: memref<256x128xbf16, #tpu.memory_space<vmem>>, %arg5: memref<1x128xf32, #tpu.memory_space<vmem>>, %arg6: memref<8x128xf32, #tpu.memory_space<vmem>>) attributes {dimension_semantics = [#tpu.dimension_semantics<parallel>], iteration_bounds = array<i64: 1>, scalar_prefetch = 0 : i64, scratch_operands = 0 : i64, tpu.core_type = #tpu.core_type<tc>, window_params = [{transform_indices = @transform_0, window_bounds = array<i64: 8, 32>}, {pipeline_mode = #tpu.pipeline_mode<synchronous>, transform_indices = @transform_1, window_bounds = array<i64: 32, 256>}, {pipeline_mode = #tpu.pipeline_mode<synchronous>, transform_indices = @transform_2, window_bounds = array<i64: 1, 256>}, {pipeline_mode = #tpu.pipeline_mode<synchronous>, transform_indices = @transform_3, window_bounds = array<i64: 256, 128>}, {pipeline_mode = #tpu.pipeline_mode<synchronous>, transform_indices = @transform_4, window_bounds = array<i64: 1, 128>}, {transform_indices = @transform_5, window_bounds = array<i64: 8, 128>}]} {
    %c0 = arith.constant 0 : index
    %c0_0 = arith.constant 0 : index
    %0 = vector.load %arg1[%c0, %c0_0] : memref<8x32xf32, #tpu.memory_space<vmem>>, vector<8x32xf32>
    %1 = arith.truncf %0 : vector<8x32xf32> to vector<8x32xbf16>
    %c0_1 = arith.constant 0 : index
    %c0_2 = arith.constant 0 : index
    %2 = vector.load %arg2[%c0_1, %c0_2] : memref<32x256xbf16, #tpu.memory_space<vmem>>, vector<32x256xbf16>
    %cst = arith.constant dense<0.000000e+00> : vector<8x256xf32>
    %3 = tpu.matmul %1, %2, %cst {dimension_numbers = #tpu.dot_dimension_numbers<[1], [0], [0], [1], [0, 0, 1, 1], [], []>} : vector<8x32xbf16>, vector<32x256xbf16>, vector<8x256xf32> -> vector<8x256xf32>
    %c0_3 = arith.constant 0 : index
    %c0_4 = arith.constant 0 : index
    %4 = vector.load %arg3[%c0_3, %c0_4] : memref<1x256xf32, #tpu.memory_space<vmem>>, vector<1x256xf32>
    %5 = vector.broadcast %4 : vector<1x256xf32> to vector<8x256xf32>
    %6 = arith.addf %3, %5 : vector<8x256xf32>
    %cst_5 = arith.constant 0.000000e+00 : f32
    %7 = vector.broadcast %cst_5 : f32 to vector<8x256xf32>
    %8 = arith.maximumf %6, %7 : vector<8x256xf32>
    %9 = arith.truncf %8 : vector<8x256xf32> to vector<8x256xbf16>
    %c0_6 = arith.constant 0 : index
    %c0_7 = arith.constant 0 : index
    %10 = vector.load %arg4[%c0_6, %c0_7] : memref<256x128xbf16, #tpu.memory_space<vmem>>, vector<256x128xbf16>
    %cst_8 = arith.constant dense<0.000000e+00> : vector<8x128xf32>
    %11 = tpu.matmul %9, %10, %cst_8 {dimension_numbers = #tpu.dot_dimension_numbers<[1], [0], [0], [1], [0, 0, 1, 1], [], []>} : vector<8x256xbf16>, vector<256x128xbf16>, vector<8x128xf32> -> vector<8x128xf32>
    %c0_9 = arith.constant 0 : index
    %c0_10 = arith.constant 0 : index
    %12 = vector.load %arg5[%c0_9, %c0_10] : memref<1x128xf32, #tpu.memory_space<vmem>>, vector<1x128xf32>
    %13 = vector.broadcast %12 : vector<1x128xf32> to vector<8x128xf32>
    %14 = arith.addf %11, %13 : vector<8x128xf32>
    %c0_11 = arith.constant 0 : index
    %c0_12 = arith.constant 0 : index
    %15 = vector.load %arg6[%c0_11, %c0_12] : memref<8x128xf32, #tpu.memory_space<vmem>>, vector<8x128xf32>
    tpu.vector_store %arg6[%c0_11, %c0_12], %14 {strides = array<i32>} : memref<8x128xf32, #tpu.memory_space<vmem>>, vector<8x128xf32>,
    return
  }
  func.func @transform_0(%arg0: i32) -> (i32, i32) {
    %c0_i32 = arith.constant 0 : i32
    %c0_i32_0 = arith.constant 0 : i32
    return %arg0, %c0_i32 : i32, i32
  }
  func.func @transform_1(%arg0: i32) -> (i32, i32) {
    %c0_i32 = arith.constant 0 : i32
    %c0_i32_0 = arith.constant 0 : i32
    %c0_i32_1 = arith.constant 0 : i32
    return %c0_i32, %c0_i32_0 : i32, i32
  }
  func.func @transform_2(%arg0: i32) -> (i32, i32) {
    %c0_i32 = arith.constant 0 : i32
    %c0_i32_0 = arith.constant 0 : i32
    %c0_i32_1 = arith.constant 0 : i32
    return %c0_i32, %c0_i32_0 : i32, i32
  }
  func.func @transform_3(%arg0: i32) -> (i32, i32) {
    %c0_i32 = arith.constant 0 : i32
    %c0_i32_0 = arith.constant 0 : i32
    %c0_i32_1 = arith.constant 0 : i32
    return %c0_i32, %c0_i32_0 : i32, i32
  }
  func.func @transform_4(%arg0: i32) -> (i32, i32) {
    %c0_i32 = arith.constant 0 : i32
    %c0_i32_0 = arith.constant 0 : i32
    %c0_i32_1 = arith.constant 0 : i32
    return %c0_i32, %c0_i32_0 : i32, i32
  }
  func.func @transform_5(%arg0: i32) -> (i32, i32) {
    %c0_i32 = arith.constant 0 : i32
    %c0_i32_0 = arith.constant 0 : i32
    return %arg0, %c0_i32 : i32, i32
  }
}

</mosaic_0001>

<bundles_post_ra>
// kernel: tpu_custom_call.1
= control target key start
LH: loop header
LB: loop body
LE: loop exit
PB: predicated region body
PF: predicated region fallthrough
CT: control target
= control target key end

     0   :  { %10 = vsyncpa [#allocation3], 0  ;;  %s602_s0 = inlined_call_operand.hbm [shape: f32[8,32], index: 0, kind: input, shape index: {}]   ;;  %s603_s1 = inlined_call_operand.hbm [shape: bf16[32,256], index: 1, kind: input, shape index: {}]   ;;  %s604_s2 = inlined_call_operand.vmem [shape: f32[1,256], index: 2, kind: input, shape index: {}]   ;;  %s605_s3 = inlined_call_operand.hbm [shape: bf16[256,128], index: 3, kind: input, shape index: {}]   ;;  %s606_s4 = inlined_call_operand.vmem [shape: f32[1,128], index: 4, kind: input, shape index: {}]   ;;  %s607_s5 = inlined_call_operand.hbm [shape: f32[8,128], index: 5, kind: output, shape index: {}]  }
   0x1   :  { %11 = vsyncpa [#allocation6], 0 }
   0x2   :  { %12 = vsyncpa [#allocation4], 0  ;;  %s509_s18 = smov [#allocation5]   ;;  %s415_s22 = scalar_lea.hbm %s603_s1, 512 }
   0x3   :  { %s28_s19 = sshll.u32 %s509_s18, 4  ;;  %p416_p0 = scmp.ne.s32.totalorder %s603_s1, %s415_s22  ;;  %s29_s19 = int_to_ptr.vmem [resolvable:$true] %s28_s19 }
   0x4   :  { %p419_p1 = scmp.lt.u32.totalorder %s415_s22, %s603_s1 }
   0x6   :  { %p421_p2 = pnand %p419_p1, %p416_p0 }
   0x8   :  { %424 = shalt.err (!%p421_p2)
}
   0x9   :  { %s425_s27 = scalar_lea.vmem %s29_s19, 512  ;;  %p430_p4 = scmp.lt.s32.totalorder %s29_s19, %s29_s19 }
   0xa   :  { %p426_p3 = scmp.ne.s32.totalorder %s29_s19, %s425_s27  ;;  %p431_p5 = scmp.lt.s32.totalorder %s425_s27, %s425_s27 }
   0xc   :  { %p432_p6 = por %p431_p5, %p430_p4 }
   0xe   :  { %p433_p7 = pnand %p432_p6, %p426_p3 }
  0x10   :  { %436 = shalt.err (!%p433_p7)
}
  0x11   :  { %s510_s28 = smov 128   ;;  %s511_s29 = smov 8  }
  0x12   :  { %34 = dma.hbm_to_vmem [thread:$0]  %s603_s1, 512, %s29_s19, [#allocation6], %s510_s28, %s510_s28, %s511_s29  }
  0x13   :  { %s512_s7 = smov [#allocation2]   ;;  %s513_s9 = smov [#allocation7]  }
  0x14   :  { %s19_s8 = sshll.u32 %s512_s7, 4  ;;  %s42_s10 = sshll.u32 %s513_s9, 4  ;;  %s20_s8 = int_to_ptr.vmem [resolvable:$true] %s19_s8  ;;  %s43_s10 = int_to_ptr.vmem [resolvable:$true] %s42_s10 }
  0x15   :  { %s437_s13 = scalar_lea.hbm %s602_s0, 128 }
  0x16   :  { %p438_p8 = scmp.ne.s32.totalorder %s602_s0, %s437_s13  ;;  %p441_p9 = scmp.lt.u32.totalorder %s437_s13, %s602_s0 }
  0x18   :  { %p443_p10 = pnand %p441_p9, %p438_p8 }
  0x1a   :  { %446 = shalt.err (!%p443_p10)
}
  0x1b   :  { %s447_s1 = scalar_lea.vmem %s20_s8, 128  ;;  %p452_p12 = scmp.lt.s32.totalorder %s20_s8, %s20_s8 }
  0x1c   :  { %p448_p11 = scmp.ne.s32.totalorder %s20_s8, %s447_s1  ;;  %p453_p13 = scmp.lt.s32.totalorder %s447_s1, %s447_s1 }
  0x1e   :  { %p454_p0 = por %p453_p13, %p452_p12 }
  0x20   :  { %p455_p1 = pnand %p454_p0, %p448_p11 }
  0x22   :  { %458 = shalt.err (!%p455_p1)
}
  0x23   :  { %22 = dma.hbm_to_vmem [thread:$0]  %s602_s0, 128, %s20_s8, [#allocation3]  }
  0x24   :  { %s459_s22 = scalar_lea.hbm %s605_s3, 2048 }
  0x25   :  { %p460_p2 = scmp.ne.s32.totalorder %s605_s3, %s459_s22  ;;  %p463_p3 = scmp.lt.u32.totalorder %s459_s22, %s605_s3 }
  0x27   :  { %p465_p4 = pnand %p463_p3, %p460_p2 }
  0x29   :  { %468 = shalt.err (!%p465_p4)
}
  0x2a   :  { %s469_s27 = scalar_lea.vmem %s43_s10, 2048  ;;  %p474_p6 = scmp.lt.s32.totalorder %s43_s10, %s43_s10 }
  0x2b   :  { %p470_p5 = scmp.ne.s32.totalorder %s43_s10, %s469_s27  ;;  %p475_p7 = scmp.lt.s32.totalorder %s469_s27, %s469_s27 }
  0x2d   :  { %p476_p8 = por %p475_p7, %p474_p6 }
  0x2f   :  { %p477_p9 = pnand %p476_p8, %p470_p5 }
  0x31   :  { %480 = shalt.err (!%p477_p9)
}
  0x32   :  { %s514_s0 = smov 64   ;;  %s515_s28 = smov 4  }
  0x33   :  { %48 = dma.hbm_to_vmem [thread:$0]  %s605_s3, 2048, %s43_s10, [#allocation6], %s514_s0, %s514_s0, %s515_s28  }
  0x34   :  { %503 = dma.done.wait [#allocation3], 128  }
  0x35   :  { %504 = vsyncadd [#allocation3], 4294967168 }
  0x36   :  { %505 = dma.done.wait [#allocation6], 2560  }
  0x37   :  { %506 = vsyncadd [#allocation6], 4294964736  ;;  %v516_v0 = vmov 0   ;;  %v393_v1 = vld [vmem:[#allocation5 + $0x4] ss:$8 sps:$4 sm:$0xff]   ;;  %v61_v5 = vld [vmem:[#allocation2] sm:$0xff]  ;;  %v69_v23 = vlaneseq }
  0x38   :  { %135 = vmatprep.mubr.bf16.mxu0 %v516_v0  ;;  %v395_v2 = vld [vmem:[#allocation5] ss:$8 sps:$4 sm:$0xff]   ;;  %103 = vmatprep.subr.bf16.mxu0 %v393_v1  ;;  %v396_v3 = vld [vmem:[#allocation5 + $0x14] ss:$8 sps:$4 sm:$0xff]   ;;  %v398_v4 = vld [vmem:[#allocation5 + $0x10] ss:$8 sps:$4 sm:$0xff]   ;;  %v62_v9 = vpack.c.bf16 %v61_v5, %v61_v5 }
  0x39   :  { %104 = vmatpush1.bf16.msra.mxu0 %v395_v2  ;;  %v399_v6 = vld [vmem:[#allocation7 + $0x40] sm:$0xff]   ;;  %v401_v8 = vld [vmem:[#allocation7 + $0x48] sm:$0xff]   ;;  %vm99_vm0 = vcmask 261120   ;;  %v403_v11 = vld [vmem:[#allocation7 + $0x50] sm:$0xff]   ;;  %v70_v24 = vshrl.u32 %v69_v23, 7 }
  0x3a   :  { %105 = vmatprep.subr.bf16.mxu0 %v396_v3  ;;  %v400_v7 = vld [vmem:[#allocation7] sm:$0xff]   ;;  %362 = vmatprep.subr.bf16.mxu1 %v399_v6  ;;  %v402_v10 = vld [vmem:[#allocation7 + $0x8] sm:$0xff]   ;;  %v404_v12 = vld [vmem:[#allocation7 + $0x10] sm:$0xff]  }
  0x3b   :  { %363 = vmatpush3.bf16.msra.mxu1 %v400_v7  ;;  %v405_v13 = vld [vmem:[#allocation7 + $0x58] sm:$0xff]   ;;  %v407_v15 = vld [vmem:[#allocation7 + $0x60] sm:$0xff]   ;;  %v409_v17 = vld [vmem:[#allocation7 + $0x68] sm:$0xff]   ;;  %v71_v25 = vsub.s32 0, %v70_v24  ;;  %v75_v27 = vsub.s32 1, %v70_v24 }
  0x3c   :  { %364 = vmatprep.subr.bf16.mxu1 %v401_v8  ;;  %v406_v14 = vld [vmem:[#allocation7 + $0x18] sm:$0xff]   ;;  %v408_v16 = vld [vmem:[#allocation7 + $0x20] sm:$0xff]   ;;  %v410_v18 = vld [vmem:[#allocation7 + $0x28] sm:$0xff]  }
  0x3d   :  { %106 = vmatpush1.bf16.msra.mxu0 %v398_v4  ;;  %v411_v19 = vld [vmem:[#allocation7 + $0x70] sm:$0xff]   ;;  %v413_v21 = vld [vmem:[#allocation7 + $0x78] sm:$0xff]  }
  0x3e   :  { %v412_v20 = vld [vmem:[#allocation7 + $0x30] sm:$0xff]   ;;  %v414_v22 = vld [vmem:[#allocation7 + $0x38] sm:$0xff]  }
  0x3f   :  { %365 = vmatpush3.bf16.msra.mxu1 %v402_v10  ;;  %v67_v26 = vld [vmem:[%s604_s2] sm:$0x3]  ;;  %s517_s2 = smov [#allocation8]  }
  0x40   :  { %344 = vmatmul.mubr.msk.bf16.vlgmr.msra.gmra.mrb[0].mxu0 %vm99_vm0, %v62_v9  ;;  %366 = vmatprep.subr.bf16.mxu1 %v403_v11  ;;  %v72_v28 = vrot.slane %v67_v26, %v71_v25  ;;  %v76_v29 = vrot.slane %v67_v26, %v75_v27  ;;  %v345_v41 = vld [vmem:[%s606_s4] ss:$0 sm:$0xff]  ;;  %s330_s9 = sshll.u32 %s517_s2, 4  ;;  %s331_s9 = int_to_ptr.vmem [resolvable:$true] %s330_s9 }
  0x41   :  { %s481_s10 = scalar_lea.vmem %s331_s9, 128  ;;  %p486_p11 = scmp.lt.s32.totalorder %s331_s9, %s331_s9 }
  0x42   :  { %p482_p10 = scmp.ne.s32.totalorder %s331_s9, %s481_s10  ;;  %p487_p12 = scmp.lt.s32.totalorder %s481_s10, %s481_s10 }
  0x43   :  { %367 = vmatpush3.bf16.msra.mxu1 %v404_v12 }
  0x44   :  { %368 = vmatprep.subr.bf16.mxu1 %v405_v13  ;;  %p488_p13 = por %p487_p12, %p486_p11 }
  0x46   :  { %p489_p0 = pnand %p488_p13, %p482_p10 }
  0x47   :  { %369 = vmatpush3.bf16.msra.mxu1 %v406_v14 }
  0x48   :  { %370 = vmatprep.subr.bf16.mxu1 %v407_v15 }
  0x4b   :  { %371 = vmatpush3.bf16.msra.mxu1 %v408_v16 }
  0x4c   :  { %372 = vmatprep.subr.bf16.mxu1 %v409_v17 }
  0x4f   :  { %373 = vmatpush3.bf16.msra.mxu1 %v410_v18 }
  0x50   :  { %374 = vmatprep.subr.bf16.mxu1 %v411_v19 }
  0x53   :  { %375 = vmatpush3.bf16.msra.mxu1 %v412_v20 }
  0x54   :  { %376 = vmatprep.subr.bf16.mxu1 %v413_v21 }
  0x57   :  { %377 = vmatpush3.bf16.msra.mxu1 %v414_v22 }
 0x113   :  { %v137_v30 = vpop.f32.mrb[0].mxu0 }
 0x114   :  { %v138_v31 = vadd.f32 %v137_v30, %v72_v28  ;;  %v139_v32 = vpop.f32.mrb[1].mxu0 }
 0x115   :  { %v140_v33 = vadd.f32 %v139_v32, %v76_v29  ;;  %v141_v34 = vpop.f32.mrb[2].mxu0 }
 0x116   :  { %v144_v35 = vmax.f32 %v138_v31, 0.0  ;;  %v142_v36 = vpop.f32.mrb[3].mxu0 }
 0x117   :  { %v145_v37 = vmax.f32 %v140_v33, 0.0 }
 0x118   :  { %v146_v39 = vpack.c.bf16 %v144_v35, %v144_v35 }
 0x119   :  { %v147_v38 = vpack.c.bf16 %v145_v37, %v145_v37 }
 0x11b   :  { %315 = vmatprep.mubr.bf16.mxu1 %v147_v38 }
 0x11c   :  { %316 = vmatmul.mubr.bf16.vlgmr.msra.gmra.mrb[0].mxu1 %v146_v39 }
 0x1ef   :  { %v378_v40 = vpop.f32.mrb[0].mxu1 }
 0x1f0   :  { %v379_v42 = vpop.f32.mrb[1].mxu1 }
 0x1f1   :  { %v380_v43 = vadd.f32 %v379_v42, %v378_v40  ;;  %v381_v44 = vpop.f32.mrb[2].mxu1 }
 0x1f2   :  { %v382_v45 = vpop.f32.mrb[3].mxu1 }
 0x1f3   :  { %v318_v46 = vadd.f32 %v380_v43, %v345_v41 }
 0x1f5   :  { %323 = vst [vmem:[#allocation8] sm:$0xff] %v318_v46 }
 0x1f6   :  { %492 = shalt.err (!%p489_p0)
}
 0x1f7   :  { %s493_s4 = scalar_lea.hbm %s607_s5, 128 }
 0x1f8   :  { %p494_p1 = scmp.ne.s32.totalorder %s607_s5, %s493_s4  ;;  %p497_p2 = scmp.lt.u32.totalorder %s493_s4, %s607_s5 }
 0x1fa   :  { %p499_p3 = pnand %p497_p2, %p494_p1 }
 0x1fc   :  { %502 = shalt.err (!%p499_p3)
}
 0x1fd   :  { %333 = dma.vmem_to_hbm [thread:$0]  %s331_s9, 128, %s607_s5, [#allocation4]  }
 0x1fe   :  { %507 = dma.done.wait [#allocation4], 128  }
 0x1ff   :  { %508 = vsyncadd [#allocation4], 4294967168 }
 0x200   :  { %337 = vsyncpa [#allocation3], 1 }
 0x201   :  { %338 = vsyncpa [#allocation6], 1 }
 0x202   :  { %339 = vsyncpa [#allocation4], 1 }

</bundles_post_ra>
